<compile_context>
chip_gen: v5e
topology: v5e:2x2
jax: 0.10.0
libtpu: 0.0.40
codegen_flags: <defaults>
</compile_context>

<pallas_src>
import functools

import jax
import jax.numpy as jnp
from jax.experimental import pallas as pl
from jax.experimental.pallas import tpu as pltpu

N_EMBD = 384      # n_embd in the PyTorch module
HEAD_SIZE = 32    # head_size


def _head_kernel(x_ref, w_ref, o_ref, *, head_size, mxu_dtype):
    # x_ref: (Bt, T, C)   one tile of batch elements
    # w_ref: (C, Hp)      fused [wq*scale | wk | wv | zero-pad], Hp multiple of 128
    # o_ref: (Bt, T, Hp)  lanes [2H:3H] carry the real output (lane-dense store)
    H = head_size
    Bt, T, C = x_ref.shape
    Hp = w_ref.shape[-1]

    # ---- fused QKV projection: one lane-dense (N = Hp >= 128) MXU matmul ----
    x2d = x_ref[...].reshape(Bt * T, C).astype(mxu_dtype)
    w = w_ref[...].astype(mxu_dtype)
    p = jnp.dot(x2d, w, preferred_element_type=jnp.float32)       # (Bt*T, Hp) f32
    p = p.reshape(Bt, T, Hp)

    q = p[..., 0:H]          # already scaled by C**-0.5 (folded into the weight)
    k = p[..., H:2 * H]

    # ---- attention scores: contract last axes directly (no explicit k.T) ----
    s = jnp.einsum("bqh,bkh->bqk",
                   q.astype(mxu_dtype), k.astype(mxu_dtype),
                   preferred_element_type=jnp.float32)            # (Bt, T, T)

    # causal (tril) mask
    row = jax.lax.broadcasted_iota(jnp.int32, (Bt, T, T), 1)
    col = jax.lax.broadcasted_iota(jnp.int32, (Bt, T, T), 2)
    s = jnp.where(col <= row, s, -jnp.inf)

    # numerically stable softmax; reciprocal on the EUP (approx) slot
    s = s - jnp.max(s, axis=-1, keepdims=True)
    e = jnp.exp(s)
    att = e * pl.reciprocal(jnp.sum(e, axis=-1, keepdims=True), approx=True)

    # dropout on `att` is the identity in eval mode
    # TODO(synk): train-mode dropout via pltpu.prng_random_bits.

    # ---- att @ P computes [att@q | att@k | att@v | 0] in one matmul ----
    # Same MXU push count as att @ v (N <= one MXU column group), but the store
    # is 128-lane dense; the wrapper slices lanes [2H:3H].
    o = jnp.einsum("bqk,bkh->bqh",
                   att.astype(mxu_dtype), p.astype(mxu_dtype),
                   preferred_element_type=jnp.float32)            # (Bt, T, Hp)
    o_ref[...] = o.astype(o_ref.dtype)


def _choose_bt(B, T, target_rows=256):
    """Pick batch-tile so each grid step has a reasonable number of matmul rows."""
    bt = max(1, min(B, max(1, target_rows // max(T, 1))))
    while B % bt:
        bt -= 1
    return bt


def head_forward(x, wk, wq, wv, *, mxu_dtype=jnp.float32):
    """x: (B, T, C); wk/wq/wv: (C, H).  Returns (B, T, H)."""
    B, T, C = x.shape
    H = wk.shape[1]
    Hp = max(128, ((3 * H + 127) // 128) * 128)   # fused/padded head dim (lane-dense)

    # Fused QKV weight; fold the C**-0.5 scale into the q columns (zero kernel cost).
    scale = C ** (-0.5)
    w_fused = jnp.concatenate(
        [wq * scale, wk, wv, jnp.zeros((C, Hp - 3 * H), dtype=x.dtype)], axis=1)

    Bt = _choose_bt(B, T)
    grid = (B // Bt,)

    kernel = functools.partial(_head_kernel, head_size=H, mxu_dtype=mxu_dtype)

    itemsize = jnp.dtype(x.dtype).itemsize
    cost = pl.CostEstimate(
        flops=2 * B * T * C * Hp + 2 * B * T * T * H + 2 * B * T * T * Hp,
        transcendentals=B * T * T + B * T,
        bytes_accessed=(x.size + w_fused.size + B * T * Hp) * itemsize,
    )

    out_wide = pl.pallas_call(
        kernel,
        out_shape=jax.ShapeDtypeStruct((B, T, Hp), x.dtype),
        grid_spec=pltpu.PrefetchScalarGridSpec(
            num_scalar_prefetch=0,
            grid=grid,
            in_specs=[
                pl.BlockSpec((Bt, T, C), lambda i: (i, 0, 0)),
                pl.BlockSpec((C, Hp), lambda i: (0, 0)),
            ],
            out_specs=pl.BlockSpec((Bt, T, Hp), lambda i: (i, 0, 0)),
        ),
        compiler_params=pltpu.CompilerParams(
            dimension_semantics=("parallel",)
        ),
        cost_estimate=cost,
    )(x, w_fused)

    # Lane-dense slab -> real head output (wrapper-side layout plumbing).
    return out_wide[..., 2 * H:3 * H]


def _reference(x, wk, wq, wv):
    B, T, C = x.shape
    k = x @ wk
    q = x @ wq
    v = x @ wv
    wei = jnp.einsum("btd,bsd->bts", q, k) * (C ** -0.5)
    mask = jnp.tril(jnp.ones((T, T), dtype=bool))
    wei = jnp.where(mask, wei, -jnp.inf)
    wei = jax.nn.softmax(wei, axis=-1)
    return jnp.einsum("bts,bsd->btd", wei, v)


if __name__ == "__main__":
    B, T, C, H = 2, 8, N_EMBD, HEAD_SIZE

    key = jax.random.PRNGKey(0)
    kx, kk, kq, kv = jax.random.split(key, 4)

    x = jax.random.normal(kx, (B, T, C), dtype=jnp.float32)
    # deterministic weight init (nn.Linear(n_embd, head_size, bias=False) shapes,
    # stored transposed so that y = x @ W)
    scale = 1.0 / jnp.sqrt(C)
    wk = jax.random.uniform(kk, (C, H), minval=-scale, maxval=scale, dtype=jnp.float32)
    wq = jax.random.uniform(kq, (C, H), minval=-scale, maxval=scale, dtype=jnp.float32)
    wv = jax.random.uniform(kv, (C, H), minval=-scale, maxval=scale, dtype=jnp.float32)

    out = head_forward(x, wk, wq, wv)   # f32 MXU inputs; pass mxu_dtype=jnp.bfloat16 on v6e/v7x
    out = jax.block_until_ready(out)

    ref = _reference(x, wk, wq, wv)
    assert out.shape == (B, T, H)
    # Tolerance slightly looser than f32 round-off to accommodate the EUP
    # approximate reciprocal used for the softmax denominator.
    assert jnp.allclose(out, ref, atol=2e-3, rtol=2e-3), "mismatch vs reference"

    print("KERNEL_OK")
</pallas_src>

<mosaic_0001>
module attributes {stable_mosaic.version = 11 : i64} {
  func.func @_head_kernel(%arg0: i32, %arg1: memref<2x8x384xf32, #tpu.memory_space<vmem>>, %arg2: memref<384x128xf32, #tpu.memory_space<vmem>>, %arg3: memref<2x8x128xf32, #tpu.memory_space<vmem>>) attributes {dimension_semantics = [#tpu.dimension_semantics<parallel>], iteration_bounds = array<i64: 1>, scalar_prefetch = 0 : i64, scratch_operands = 0 : i64, tpu.core_type = #tpu.core_type<tc>, window_params = [{transform_indices = @transform_0, window_bounds = array<i64: 2, 8, 384>}, {pipeline_mode = #tpu.pipeline_mode<synchronous>, transform_indices = @transform_1, window_bounds = array<i64: 384, 128>}, {transform_indices = @transform_2, window_bounds = array<i64: 2, 8, 128>}]} {
    %c0 = arith.constant 0 : index
    %c0_0 = arith.constant 0 : index
    %c0_1 = arith.constant 0 : index
    %0 = vector.load %arg1[%c0, %c0_0, %c0_1] : memref<2x8x384xf32, #tpu.memory_space<vmem>>, vector<2x8x384xf32>
    %1 = vector.shape_cast %0 : vector<2x8x384xf32> to vector<16x384xf32>
    %c0_2 = arith.constant 0 : index
    %c0_3 = arith.constant 0 : index
    %2 = vector.load %arg2[%c0_2, %c0_3] : memref<384x128xf32, #tpu.memory_space<vmem>>, vector<384x128xf32>
    %cst = arith.constant dense<0.000000e+00> : vector<16x128xf32>
    %3 = tpu.matmul %1, %2, %cst {dimension_numbers = #tpu.dot_dimension_numbers<[1], [0], [0], [1], [0, 0, 1, 1], [], []>} : vector<16x384xf32>, vector<384x128xf32>, vector<16x128xf32> -> vector<16x128xf32>
    %4 = vector.shape_cast %3 : vector<16x128xf32> to vector<2x8x128xf32>
    %5 = vector.extract_strided_slice %4 {offsets = [0, 0, 0], sizes = [2, 8, 32], strides = [1, 1, 1]} : vector<2x8x128xf32> to vector<2x8x32xf32>
    %6 = vector.extract_strided_slice %4 {offsets = [0, 0, 32], sizes = [2, 8, 32], strides = [1, 1, 1]} : vector<2x8x128xf32> to vector<2x8x32xf32>
    "tpu.trace_start"() <{level = 10 : i32, message = "bqh,bkh->bqk"}> : () -> ()
    %cst_4 = arith.constant dense<0.000000e+00> : vector<2x8x8xf32>
    %7 = tpu.matmul %5, %6, %cst_4 {dimension_numbers = #tpu.dot_dimension_numbers<[2], [2], [1], [1], [0, 0, 0, 1, 1, 1], [0], [0]>} : vector<2x8x32xf32>, vector<2x8x32xf32>, vector<2x8x8xf32> -> vector<2x8x8xf32>
    "tpu.trace_stop"() : () -> ()
    %8 = tpu.iota {dimensions = array<i32: 1>} : vector<2x8x8xi32>
    %9 = tpu.iota {dimensions = array<i32: 2>} : vector<2x8x8xi32>
    %10 = arith.cmpi sle, %9, %8 : vector<2x8x8xi32>
    %cst_5 = arith.constant 0xFF800000 : f32
    %11 = vector.broadcast %cst_5 : f32 to vector<2x8x8xf32>
    %12 = arith.select %10, %7, %11 : vector<2x8x8xi1>, vector<2x8x8xf32>
    %cst_6 = arith.constant dense<0xFF800000> : vector<2x8xf32>
    %13 = vector.multi_reduction <maximumf>, %12, %cst_6 [2] : vector<2x8x8xf32> to vector<2x8xf32>
    %14 = vector.shape_cast %13 : vector<2x8xf32> to vector<2x8x1xf32>
    %15 = vector.broadcast %14 : vector<2x8x1xf32> to vector<2x8x8xf32>
    %16 = arith.subf %12, %15 : vector<2x8x8xf32>
    %17 = math.exp %16 : vector<2x8x8xf32>
    %cst_7 = arith.constant dense<0.000000e+00> : vector<2x8xf32>
    %18 = vector.multi_reduction <add>, %17, %cst_7 [2] : vector<2x8x8xf32> to vector<2x8xf32>
    %19 = vector.shape_cast %18 : vector<2x8xf32> to vector<2x8x1xf32>
    %20 = tpu.reciprocal %19 {approx = true} : vector<2x8x1xf32> -> vector<2x8x1xf32>
    %21 = vector.broadcast %20 : vector<2x8x1xf32> to vector<2x8x8xf32>
    %22 = arith.mulf %17, %21 : vector<2x8x8xf32>
    "tpu.trace_start"() <{level = 10 : i32, message = "bqk,bkh->bqh"}> : () -> ()
    %cst_8 = arith.constant dense<0.000000e+00> : vector<2x8x128xf32>
    %23 = tpu.matmul %22, %4, %cst_8 {dimension_numbers = #tpu.dot_dimension_numbers<[2], [1], [1], [2], [0, 0, 0, 1, 1, 2], [0], [0]>} : vector<2x8x8xf32>, vector<2x8x128xf32>, vector<2x8x128xf32> -> vector<2x8x128xf32>
    "tpu.trace_stop"() : () -> ()
    %c0_9 = arith.constant 0 : index
    %c0_10 = arith.constant 0 : index
    %c0_11 = arith.constant 0 : index
    %24 = vector.load %arg3[%c0_9, %c0_10, %c0_11] : memref<2x8x128xf32, #tpu.memory_space<vmem>>, vector<2x8x128xf32>
    tpu.vector_store %arg3[%c0_9, %c0_10, %c0_11], %23 {strides = array<i32>} : memref<2x8x128xf32, #tpu.memory_space<vmem>>, vector<2x8x128xf32>,
    return
  }
  func.func @transform_0(%arg0: i32) -> (i32, i32, i32) {
    %c0_i32 = arith.constant 0 : i32
    %c0_i32_0 = arith.constant 0 : i32
    %c0_i32_1 = arith.constant 0 : i32
    return %arg0, %c0_i32, %c0_i32_0 : i32, i32, i32
  }
  func.func @transform_1(%arg0: i32) -> (i32, i32) {
    %c0_i32 = arith.constant 0 : i32
    %c0_i32_0 = arith.constant 0 : i32
    %c0_i32_1 = arith.constant 0 : i32
    return %c0_i32, %c0_i32_0 : i32, i32
  }
  func.func @transform_2(%arg0: i32) -> (i32, i32, i32) {
    %c0_i32 = arith.constant 0 : i32
    %c0_i32_0 = arith.constant 0 : i32
    %c0_i32_1 = arith.constant 0 : i32
    return %arg0, %c0_i32, %c0_i32_0 : i32, i32, i32
  }
}

</mosaic_0001>

<bundles_post_ra>
// kernel: tpu_custom_call.1
= control target key start
LH: loop header
LB: loop body
LE: loop exit
PB: predicated region body
PF: predicated region fallthrough
CT: control target
= control target key end

     0   :  { %7 = vsyncpa [#allocation3], 0  ;;  %s464_s0 = inlined_call_operand.hbm [shape: f32[2,8,384], index: 0, kind: input, shape index: {}]   ;;  %s465_s1 = inlined_call_operand.hbm [shape: f32[384,128], index: 1, kind: input, shape index: {}]   ;;  %s466_s2 = inlined_call_operand.hbm [shape: f32[2,8,128], index: 2, kind: output, shape index: {}]  }
   0x1   :  { %8 = vsyncpa [#allocation6], 0 }
   0x2   :  { %9 = vsyncpa [#allocation4], 0  ;;  %s14_s11 = sshll.u32 %s464_s0, 4  ;;  %s420_s12 = smov [#allocation2]   ;;  %s15_s11 = int_to_ptr.hbm [resolvable:$true] %s14_s11 }
   0x3   :  { %s16_s13 = sshll.u32 %s420_s12, 4  ;;  %s27_s16 = sshll.u32 %s465_s1, 4  ;;  %s17_s13 = int_to_ptr.vmem [resolvable:$true] %s16_s13  ;;  %s28_s16 = int_to_ptr.hbm [resolvable:$true] %s27_s16 }
   0x4   :  { %s421_s17 = smov 384   ;;  %s422_s18 = smov 24  }
   0x5   :  { %22 = dma.hbm_to_vmem [thread:$0]  %s15_s11, 768, %s17_s13, [#allocation3], %s421_s17, %s421_s17, %s422_s18  }
   0x6   :  { %s423_s19 = smov [#allocation5]   ;;  %s424_s21 = smov 128  }
   0x7   :  { %s29_s20 = sshll.u32 %s423_s19, 4  ;;  %s425_s22 = smov 8   ;;  %s30_s20 = int_to_ptr.vmem [resolvable:$true] %s29_s20 }
   0x8   :  { %35 = dma.hbm_to_vmem [thread:$0]  %s28_s16, 6144, %s30_s20, [#allocation6], %s424_s21, %s424_s21, %s425_s22  }
   0x9   :  { %414 = dma.done.wait [#allocation3], 768  }
   0xa   :  { %415 = vsyncadd [#allocation3], 4294966528 }
   0xb   :  { %416 = dma.done.wait [#allocation6], 6144  }
   0xc   :  { %417 = vsyncadd [#allocation6], 4294961152  ;;  %v97_v0 = vld [vmem:[#allocation5 + $0x178] sm:$0xff]  ;;  %v96_v1 = vld [vmem:[#allocation5 + $0x170] sm:$0xff]  ;;  %s426_s0 = smov 96   ;;  %vm170_vm0 = vcmask 261120  }
   0xd   :  { %v65_v2 = vld [vmem:[#allocation5 + $0x78] sm:$0xff]  ;;  %144 = vmatpush.msra.mxu2 %v97_v0  ;;  %v64_v4 = vld [vmem:[#allocation5 + $0x70] sm:$0xff]  ;;  %v95_v5 = vld [vmem:[#allocation5 + $0x168] sm:$0xff]  ;;  %vm229_vm2 = vcmask 64512   ;;  %s427_s1 = smov [#allocation7]   ;;  %s306_s26 = sshll.u32 %s466_s2, 4  ;;  %s307_s26 = int_to_ptr.hbm [resolvable:$true] %s306_s26 }
   0xe   :  { %98 = vmatpush.msra.mxu0 %v65_v2  ;;  %v81_v3 = vld [vmem:[#allocation5 + $0xf8] sm:$0xff]  ;;  %v80_v6 = vld [vmem:[#allocation5 + $0xf0] sm:$0xff]  ;;  %v63_v7 = vld [vmem:[#allocation5 + $0x68] sm:$0xff]  ;;  %v222_v2 = vlaneseq  ;;  %s304_s23 = sshll.u32 %s427_s1, 4  ;;  %s305_s23 = int_to_ptr.vmem [resolvable:$true] %s304_s23 }
   0xf   :  { %121 = vmatpush.msra.mxu1 %v81_v3  ;;  %145 = vmatpush.msra.mxu2 %v96_v1  ;;  %v79_v8 = vld [vmem:[#allocation5 + $0xe8] sm:$0xff]  ;;  %v94_v9 = vld [vmem:[#allocation5 + $0x160] sm:$0xff]  ;;  %v93_v12 = vld [vmem:[#allocation5 + $0x158] sm:$0xff] }
  0x10   :  { %99 = vmatpush.msra.mxu0 %v64_v4  ;;  %v62_v10 = vld [vmem:[#allocation5 + $0x60] sm:$0xff]  ;;  %v61_v13 = vld [vmem:[#allocation5 + $0x58] sm:$0xff]  ;;  %v92_v15 = vld [vmem:[#allocation5 + $0x150] sm:$0xff]  ;;  %v223_v3 = vshrl.u32 %v222_v2, 7  ;;  %v225_v4 = vand.u32 127, %v222_v2 }
  0x11   :  { %122 = vmatpush.msra.mxu1 %v80_v6  ;;  %146 = vmatpush.msra.mxu2 %v95_v5  ;;  %v78_v11 = vld [vmem:[#allocation5 + $0xe0] sm:$0xff]  ;;  %v77_v14 = vld [vmem:[#allocation5 + $0xd8] sm:$0xff]  ;;  %v60_v16 = vld [vmem:[#allocation5 + $0x50] sm:$0xff] }
  0x12   :  { %100 = vmatpush.msra.mxu0 %v63_v7  ;;  %v76_v17 = vld [vmem:[#allocation5 + $0xd0] sm:$0xff]  ;;  %v91_v18 = vld [vmem:[#allocation5 + $0x148] sm:$0xff]  ;;  %v90_v21 = vld [vmem:[#allocation5 + $0x140] sm:$0xff]  ;;  %vm226_vm1 = vcmp.le.s32.totalorder %v225_v4, %v223_v3 }
  0x13   :  { %123 = vmatpush.msra.mxu1 %v79_v8  ;;  %147 = vmatpush.msra.mxu2 %v94_v9  ;;  %v59_v19 = vld [vmem:[#allocation5 + $0x48] sm:$0xff]  ;;  %v58_v22 = vld [vmem:[#allocation5 + $0x40] sm:$0xff]  ;;  %v89_v24 = vld [vmem:[#allocation5 + $0x138] sm:$0xff] }
  0x14   :  { %101 = vmatpush.msra.mxu0 %v62_v10  ;;  %v75_v20 = vld [vmem:[#allocation5 + $0xc8] sm:$0xff]  ;;  %v74_v23 = vld [vmem:[#allocation5 + $0xc0] sm:$0xff]  ;;  %v57_v25 = vld [vmem:[#allocation5 + $0x38] sm:$0xff] }
  0x15   :  { %124 = vmatpush.msra.mxu1 %v78_v11  ;;  %148 = vmatpush.msra.mxu2 %v93_v12  ;;  %v73_v26 = vld [vmem:[#allocation5 + $0xb8] sm:$0xff]  ;;  %v88_v27 = vld [vmem:[#allocation5 + $0x130] sm:$0xff]  ;;  %v87_v30 = vld [vmem:[#allocation5 + $0x128] sm:$0xff] }
  0x16   :  { %102 = vmatpush.msra.mxu0 %v61_v13  ;;  %v56_v28 = vld [vmem:[#allocation5 + $0x30] sm:$0xff]  ;;  %v55_v31 = vld [vmem:[#allocation5 + $0x28] sm:$0xff]  ;;  %v86_v33 = vld [vmem:[#allocation5 + $0x120] sm:$0xff] }
  0x17   :  { %125 = vmatpush.msra.mxu1 %v77_v14  ;;  %149 = vmatpush.msra.mxu2 %v92_v15  ;;  %v72_v29 = vld [vmem:[#allocation5 + $0xb0] sm:$0xff]  ;;  %v71_v32 = vld [vmem:[#allocation5 + $0xa8] sm:$0xff]  ;;  %v54_v34 = vld [vmem:[#allocation5 + $0x20] sm:$0xff] }
  0x18   :  { %103 = vmatpush.msra.mxu0 %v60_v16  ;;  %v70_v35 = vld [vmem:[#allocation5 + $0xa0] sm:$0xff]  ;;  %v85_v36 = vld [vmem:[#allocation5 + $0x118] sm:$0xff]  ;;  %v84_v39 = vld [vmem:[#allocation5 + $0x110] sm:$0xff] }
  0x19   :  { %126 = vmatpush.msra.mxu1 %v76_v17  ;;  %150 = vmatpush.msra.mxu2 %v91_v18  ;;  %v53_v37 = vld [vmem:[#allocation5 + $0x18] sm:$0xff]  ;;  %v52_v40 = vld [vmem:[#allocation5 + $0x10] sm:$0xff]  ;;  %v83_v42 = vld [vmem:[#allocation5 + $0x108] sm:$0xff] }
  0x1a   :  { %104 = vmatpush.msra.mxu0 %v59_v19  ;;  %v69_v38 = vld [vmem:[#allocation5 + $0x98] sm:$0xff]  ;;  %v68_v41 = vld [vmem:[#allocation5 + $0x90] sm:$0xff]  ;;  %v51_v43 = vld [vmem:[#allocation5 + $0x8] sm:$0xff] }
  0x1b   :  { %127 = vmatpush.msra.mxu1 %v75_v20  ;;  %151 = vmatpush.msra.mxu2 %v90_v21  ;;  %v67_v44 = vld [vmem:[#allocation5 + $0x88] sm:$0xff]  ;;  %v82_v45 = vld [vmem:[#allocation5 + $0x100] sm:$0xff]  ;;  %v44_v49 = vld [vmem:[#allocation2] sm:$0xff] }
  0x1c   :  { %105 = vmatpush.msra.mxu0 %v58_v22  ;;  %v50_v46 = vld [vmem:[#allocation5] sm:$0xff]  ;;  %v45_v50 = vld [vmem:[#allocation2 + $0x8] sm:$0xff]  ;;  %v47_v52 = vld [vmem:[#allocation2 + $0x18] sm:$0xff] }
  0x1d   :  { %128 = vmatpush.msra.mxu1 %v74_v23  ;;  %152 = vmatpush.msra.mxu2 %v89_v24  ;;  %v46_v47 = vld [vmem:[#allocation2 + $0x10] sm:$0xff]  ;;  %v49_v51 = vld [vmem:[#allocation2 + $0x28] sm:$0xff]  ;;  %v48_v53 = vld [vmem:[#allocation2 + $0x20] sm:$0xff] }
  0x1e   :  { %106 = vmatpush.msra.mxu0 %v57_v25  ;;  %v66_v48 = vld [vmem:[#allocation5 + $0x80] sm:$0xff] }
  0x1f   :  { %129 = vmatpush.msra.mxu1 %v73_v26  ;;  %153 = vmatpush.msra.mxu2 %v88_v27 }
  0x20   :  { %107 = vmatpush.msra.mxu0 %v56_v28 }
  0x21   :  { %130 = vmatpush.msra.mxu1 %v72_v29  ;;  %154 = vmatpush.msra.mxu2 %v87_v30 }
  0x22   :  { %108 = vmatpush.msra.mxu0 %v55_v31 }
  0x23   :  { %131 = vmatpush.msra.mxu1 %v71_v32  ;;  %155 = vmatpush.msra.mxu2 %v86_v33 }
  0x24   :  { %109 = vmatpush.msra.mxu0 %v54_v34 }
  0x25   :  { %132 = vmatpush.msra.mxu1 %v70_v35  ;;  %156 = vmatpush.msra.mxu2 %v85_v36 }
  0x26   :  { %110 = vmatpush.msra.mxu0 %v53_v37 }
  0x27   :  { %133 = vmatpush.msra.mxu1 %v69_v38  ;;  %157 = vmatpush.msra.mxu2 %v84_v39 }
  0x28   :  { %111 = vmatpush.msra.mxu0 %v52_v40 }
  0x29   :  { %134 = vmatpush.msra.mxu1 %v68_v41  ;;  %158 = vmatpush.msra.mxu2 %v83_v42 }
  0x2a   :  { %112 = vmatpush.msra.mxu0 %v51_v43 }
  0x2b   :  { %135 = vmatpush.msra.mxu1 %v67_v44  ;;  %159 = vmatpush.msra.mxu2 %v82_v45 }
  0x2c   :  { %113 = vmatpush.msra.mxu0 %v50_v46  ;;  %160 = vmatmul.f32.vlgmr.msra.gmra.mxu2 %v46_v47 }
  0x2d   :  { %136 = vmatpush.msra.mxu1 %v66_v48  ;;  %114 = vmatmul.f32.vlgmr.msra.gmra.mxu0 %v44_v49 }
  0x2e   :  { %137 = vmatmul.f32.vlgmr.msra.gmra.mxu1 %v45_v50 }
  0x34   :  { %163 = vmatmul.f32.gmra.mxu2 %v49_v51 }
  0x35   :  { %117 = vmatmul.f32.gmra.mxu0 %v47_v52 }
  0x36   :  { %140 = vmatmul.f32.gmra.mxu1 %v48_v53 }
  0xaa   :  { %v115_v54 = vpop.f32.mrf.mxu0 }
  0xab   :  { %v138_v55 = vpop.f32.mrf.mxu1 }
  0xac   :  { %v139_v56 = vadd.f32 %v138_v55, %v115_v54 }
  0xaf   :  { %v161_v57 = vpop.f32.mrf.mxu2 }
  0xb0   :  { %v162_v58 = vadd.f32 %v161_v57, %v139_v56 }
  0xb2   :  { %168 = vrot.lane.b32.xlu0 %v162_v58, %s426_s0  ;;  %v118_v59 = vpop.f32.mrf.mxu0 }
  0xb3   :  { %v141_v60 = vpop.f32.mrf.mxu1 }
  0xb4   :  { %v142_v61 = vadd.f32 %v141_v60, %v118_v59 }
  0xb7   :  { %v164_v62 = vpop.f32.mrf.mxu2 }
  0xb8   :  { %v165_v63 = vadd.f32 %v164_v62, %v142_v61 }
  0xba   :  { %196 = vrot.lane.b32.xlu0 %v165_v63, %s426_s0 }
 0x124   :  { %v169_v0 = vpop.permute.xlu0 %168 }
 0x125   :  { %320 = vmatpush.xpose.msk.msra.mxu3 %vm170_vm0, %v169_v0 }
 0x128   :  { %321 = vmatmul.msk.f32.vlgmr.msra.gmra.mxu3 %vm170_vm0, %v162_v58 }
 0x12c   :  { %v197_v1 = vpop.permute.xlu0 %196 }
 0x12d   :  { %322 = vmatpush.xpose.msk.msrb.mxu3 %vm170_vm0, %v197_v1 }
 0x130   :  { %323 = vmatmul.msk.f32.vlgmr.msrb.gmra.mxu3 %vm170_vm0, %v165_v63 }
 0x131   :  { %270 = vmatpush.msra.mxu3 %v162_v58 }
 0x133   :  { %293 = vmatpush.msrb.mxu3 %v165_v63 }
 0x1ab   :  { %v192_v5 = vpop.f32.mrf.mxu3 }
 0x1ac   :  { %v227_v6 = vsel %vm226_vm1, %v192_v5, -inf }
 0x1ad   :  { %v230_v7 = vsel %vm229_vm2, %v227_v6, -inf }
 0x1ae   :  { %231 = vmax.xlane.f32.xlu1 %v230_v7 }
 0x1b3   :  { %v219_v8 = vpop.f32.mrf.mxu3 }
 0x1b4   :  { %v228_v9 = vsel %vm226_vm1, %v219_v8, -inf }
 0x1b5   :  { %v233_v10 = vsel %vm229_vm2, %v228_v9, -inf }
 0x1b6   :  { %234 = vmax.xlane.f32.xlu1 %v233_v10 }
 0x221   :  { %v232_v11 = vpop.xlane.xlu1 %231 }
 0x222   :  { %v236_v12 = vsub.f32 %v227_v6, %v232_v11 }
 0x224   :  { %v238_v13 = vmul.f32 1.442695, %v236_v12 }
 0x226   :  { %334 = vpow2.f32 %v238_v13 }
 0x229   :  { %v235_v14 = vpop.xlane.xlu1 %234 }
 0x22a   :  { %v237_v15 = vsub.f32 %v228_v9, %v235_v14 }
 0x22c   :  { %v335_v16 = vpop.eup %334  ;;  %v240_v17 = vmul.f32 1.442695, %v237_v15 }
 0x22d   :  { %v242_v18 = vsel %vm229_vm2, %v335_v16, 0.0 }
 0x22e   :  { %336 = vpow2.f32 %v240_v17  ;;  %243 = vadd.xlane.f32.xlu2 %v242_v18 }
 0x234   :  { %v337_v19 = vpop.eup %336 }
 0x235   :  { %v245_v20 = vsel %vm229_vm2, %v337_v19, 0.0 }
 0x236   :  { %246 = vadd.xlane.f32.xlu2 %v245_v20 }
 0x2a1   :  { %v244_v21 = vpop.xlane.xlu2 %243 }
 0x2a2   :  { %338 = vrcp.f32 %v244_v21 }
 0x2a8   :  { %v339_v22 = vpop.eup %338 }
 0x2a9   :  { %v250_v23 = vmul.f32 %v339_v22, %v335_v16  ;;  %v247_v24 = vpop.xlane.xlu2 %246 }
 0x2aa   :  { %340 = vrcp.f32 %v247_v24 }
 0x2ab   :  { %324 = vmatmul.msk.f32.vlgmr.msra.gmra.mxu3 %vm229_vm2, %v250_v23 }
 0x2b0   :  { %v341_v25 = vpop.eup %340 }
 0x2b1   :  { %v251_v26 = vmul.f32 %v341_v25, %v337_v19 }
 0x2b3   :  { %325 = vmatmul.msk.f32.vlgmr.msrb.gmra.mxu3 %vm229_vm2, %v251_v26 }
 0x32e   :  { %v272_v27 = vpop.f32.mrf.mxu3 }
 0x32f   :  { %298 = vst [vmem:[#allocation7] sm:$0xff] %v272_v27 }
 0x336   :  { %v295_v28 = vpop.f32.mrf.mxu3 }
 0x337   :  { %299 = vst [vmem:[#allocation7 + $0x8] sm:$0xff] %v295_v28 }
 0x338   :  { %312 = dma.vmem_to_hbm [thread:$0]  %s305_s23, 256, %s307_s26, [#allocation4], %s424_s21, %s424_s21, %s425_s22  }
 0x339   :  { %418 = dma.done.wait [#allocation4], 256  }
 0x33a   :  { %419 = vsyncadd [#allocation4], 4294967040 }
 0x33b   :  { %317 = vsyncpa [#allocation3], 1 }
 0x33c   :  { %318 = vsyncpa [#allocation6], 1 }
 0x33d   :  { %319 = vsyncpa [#allocation4], 1 }

</bundles_post_ra>
